<compile_context>
chip_gen: v6e
topology: v6e:2x2x1
jax: 0.10.0
libtpu: 0.0.40
codegen_flags: <defaults>
</compile_context>

<pallas_src>
import functools
import math

import jax
import jax.numpy as jnp
from jax import lax
from jax.experimental import pallas as pl
from jax.experimental.pallas import tpu as pltpu

LANE = 128
SUBLANE_BF16 = 16  # bf16 packs two rows per sublane; keep row tiles /16


def _round_up(x, m):
    return (x + m - 1) // m * m


def _pad2d(a, rows, cols):
    r, c = a.shape
    if r == rows and c == cols:
        return a
    return jnp.pad(a, ((0, rows - r), (0, cols - c)))


def _vmem_limit_bytes(frac=0.85, fallback_bytes=64 * 1024 * 1024):
    """Physical VMEM capacity minus headroom for Mosaic internal scratch."""
    try:
        cap = int(pltpu.get_tpu_info().vmem_capacity_bytes)
    except Exception:
        cap = fallback_bytes
    return int(cap * frac)


def mlp_residual_kernel(x_ref, wcat_ref, bcat_ref, w2_ref, b2_ref,
                        gamma_ref, beta_ref, o_ref, *, out_dim, out_pad):
    # x tile and weights are bf16; all MXU accumulation is f32.
    x = x_ref[...]

    # Fused (W1 | Wr): one wide matmul, sliced on a lane-aligned boundary.
    z = jnp.dot(x, wcat_ref[...], preferred_element_type=jnp.float32)
    z = z + bcat_ref[...]                       # f32 biases
    h_pre = z[:, :out_pad]                      # Linear(in, out) pre-activation
    x_res = z[:, out_pad:]                      # lin_res output

    # Sigmoid in f32 on the EUP; cast only to feed the second matmul.
    h = jax.nn.sigmoid(h_pre).astype(w2_ref.dtype)
    x_emb = jnp.dot(h, w2_ref[...], preferred_element_type=jnp.float32)
    x_emb = x_emb + b2_ref[...]
    # Dropout(p=0.0) / eval mode -> identity.

    y = x_res + x_emb

    # LayerNorm over the *true* feature dim (eps=1e-5, biased variance), f32.
    inv_n = 1.0 / out_dim
    if out_dim != out_pad:
        lane_ids = lax.broadcasted_iota(jnp.int32, y.shape, 1)
        mask = lane_ids < out_dim
        y = jnp.where(mask, y, 0.0)             # explicit: no reliance on pad zeros
        mean = jnp.sum(y, axis=-1, keepdims=True) * inv_n
        centered = jnp.where(mask, y - mean, 0.0)
    else:
        # Lane-dense feature dim: skip the mask entirely (saves 2 VPU passes).
        mean = jnp.sum(y, axis=-1, keepdims=True) * inv_n
        centered = y - mean
    var = jnp.sum(centered * centered, axis=-1, keepdims=True) * inv_n
    y_norm = centered * lax.rsqrt(var + 1e-5)
    out = y_norm * gamma_ref[...] + beta_ref[...]

    o_ref[...] = out.astype(o_ref.dtype)


def pack_params(params, *, matmul_dtype=jnp.bfloat16):
    """One-time layout plumbing (call once per parameter set, reuse per step):
    pad feature dims to lane multiples, fuse the two shared-LHS weights into
    one wide [in_pad, 2*out_pad] block, cast matmul operands to bf16."""
    w1, b1, w2, b2, wr, br, gamma, beta = params
    in_dim, out_dim = w1.shape
    in_pad = _round_up(in_dim, LANE)
    out_pad = _round_up(out_dim, LANE)

    w_cat = jnp.concatenate(
        [_pad2d(w1, in_pad, out_pad), _pad2d(wr, in_pad, out_pad)],
        axis=1).astype(matmul_dtype)
    b_cat = jnp.concatenate(
        [_pad2d(b1, 1, out_pad), _pad2d(br, 1, out_pad)],
        axis=1).astype(jnp.float32)
    w2_p = _pad2d(w2, out_pad, out_pad).astype(matmul_dtype)
    b2_p = _pad2d(b2, 1, out_pad).astype(jnp.float32)
    gamma_p = _pad2d(gamma, 1, out_pad).astype(jnp.float32)
    beta_p = _pad2d(beta, 1, out_pad).astype(jnp.float32)

    meta = {"in_dim": in_dim, "out_dim": out_dim,
            "in_pad": in_pad, "out_pad": out_pad}
    return (w_cat, b_cat, w2_p, b2_p, gamma_p, beta_p), meta


def mlp_residual(x, packed, meta, *, tm=512, matmul_dtype=jnp.bfloat16):
    """x: [N, in_dim] float32, packed/meta from pack_params -> [N, out_dim] f32."""
    w_cat, b_cat, w2_p, b2_p, gamma_p, beta_p = packed
    N, in_dim = x.shape
    assert in_dim == meta["in_dim"]
    out_dim = meta["out_dim"]
    in_pad = meta["in_pad"]
    out_pad = meta["out_pad"]

    # Large row tiles for MXU occupancy / per-step overhead amortization,
    # clamped for small N, kept a multiple of 16 bf16 sublanes.
    tm = max(SUBLANE_BF16, min(tm, _round_up(N, SUBLANE_BF16)))
    n_pad = _round_up(N, tm)
    # Guarantee >=2 grid steps when there is enough work, so the "parallel"
    # row axis can be sharded across v7x's two TensorCores.
    if N > SUBLANE_BF16 and n_pad // tm < 2:
        tm = max(SUBLANE_BF16, _round_up(-(-N // 2), SUBLANE_BF16))
        n_pad = _round_up(N, tm)

    x_p = _pad2d(x, n_pad, in_pad).astype(matmul_dtype)

    grid = (n_pad // tm,)
    row_spec = lambda shape: pl.BlockSpec(shape, lambda i: (i, 0))
    # Grid-invariant operands: single-buffered (nothing to pipeline; halves
    # their VMEM footprint vs the default double buffering).
    inv_spec = lambda shape: pl.BlockSpec(shape, lambda i: (0, 0),
                                          pipeline_mode=pl.Buffered(1))

    kernel = functools.partial(mlp_residual_kernel,
                               out_dim=out_dim, out_pad=out_pad)

    # TODO(synk): when (in_pad*2*out_pad + out_pad*out_pad)*2B approaches
    # ~60% of VMEM (first on v7x's 64 MiB), add grid axes tiling the output
    # feature dim and the second matmul's K dim with an f32 VMEM accumulator
    # and pl.when init/finalize instead of keeping full weights resident.
    out_padded = pl.pallas_call(
        kernel,
        out_shape=jax.ShapeDtypeStruct((n_pad, out_pad), x.dtype),
        grid_spec=pltpu.PrefetchScalarGridSpec(
            num_scalar_prefetch=0,
            grid=grid,
            in_specs=[
                row_spec((tm, in_pad)),             # x tile (bf16)
                inv_spec((in_pad, 2 * out_pad)),    # [W1 | Wr] (bf16)
                inv_spec((1, 2 * out_pad)),         # [b1 | br] (f32)
                inv_spec((out_pad, out_pad)),       # W2 (bf16)
                inv_spec((1, out_pad)),             # b2
                inv_spec((1, out_pad)),             # gamma
                inv_spec((1, out_pad)),             # beta
            ],
            out_specs=row_spec((tm, out_pad)),
        ),
        compiler_params=pltpu.CompilerParams(
            dimension_semantics=("parallel",),
            vmem_limit_bytes=_vmem_limit_bytes(),
        ),
    )(x_p, w_cat, b_cat, w2_p, b2_p, gamma_p, beta_p)

    return out_padded[:N, :out_dim]


def init_params(key, in_dim, out_dim):
    """Deterministic PyTorch-style uniform(-1/sqrt(fan_in), 1/sqrt(fan_in)) init."""
    ks = jax.random.split(key, 6)

    def linear(kw, kb, fan_in, fan_out):
        bound = 1.0 / math.sqrt(fan_in)
        w = jax.random.uniform(kw, (fan_in, fan_out), jnp.float32, -bound, bound)
        b = jax.random.uniform(kb, (1, fan_out), jnp.float32, -bound, bound)
        return w, b

    w1, b1 = linear(ks[0], ks[1], in_dim, out_dim)
    w2, b2 = linear(ks[2], ks[3], out_dim, out_dim)
    wr, br = linear(ks[4], ks[5], in_dim, out_dim)
    gamma = jnp.ones((1, out_dim), jnp.float32)
    beta = jnp.zeros((1, out_dim), jnp.float32)
    return (w1, b1, w2, b2, wr, br, gamma, beta)


def mlp_residual_ref(x, params, matmul_dtype=jnp.bfloat16):
    """Pure-JAX reference using the same bf16-operand / f32-accumulate matmuls."""
    w1, b1, w2, b2, wr, br, gamma, beta = params

    def mm(a, b):
        return jnp.dot(a.astype(matmul_dtype), b.astype(matmul_dtype),
                       preferred_element_type=jnp.float32)

    h = jax.nn.sigmoid(mm(x, w1) + b1)
    x_emb = mm(h, w2) + b2
    x_res = mm(x, wr) + br
    y = x_emb + x_res
    mean = jnp.mean(y, axis=-1, keepdims=True)
    var = jnp.mean((y - mean) ** 2, axis=-1, keepdims=True)
    return (y - mean) / jnp.sqrt(var + 1e-5) * gamma + beta


if __name__ == "__main__":
    key = jax.random.PRNGKey(0)
    k_x, k_p = jax.random.split(key)

    N, in_dim, out_dim = 8, 32, 32
    x = jax.random.normal(k_x, (N, in_dim), jnp.float32)
    params = init_params(k_p, in_dim, out_dim)

    packed, meta = pack_params(params)          # one-time weight packing
    out = mlp_residual(x, packed, meta)
    out = jax.block_until_ready(out)

    ref = mlp_residual_ref(x, params)
    assert out.shape == (N, out_dim)
    assert jnp.allclose(out, ref, atol=1e-4, rtol=1e-4), (
        f"max abs err = {jnp.max(jnp.abs(out - ref))}")

    print("KERNEL_OK")
</pallas_src>

<mosaic_0001>
module attributes {stable_mosaic.version = 11 : i64} {
  func.func @mlp_residual_kernel(%arg0: i32, %arg1: memref<16x128xbf16, #tpu.memory_space<vmem>>, %arg2: memref<128x256xbf16, #tpu.memory_space<vmem>>, %arg3: memref<1x256xf32, #tpu.memory_space<vmem>>, %arg4: memref<128x128xbf16, #tpu.memory_space<vmem>>, %arg5: memref<1x128xf32, #tpu.memory_space<vmem>>, %arg6: memref<1x128xf32, #tpu.memory_space<vmem>>, %arg7: memref<1x128xf32, #tpu.memory_space<vmem>>, %arg8: memref<16x128xf32, #tpu.memory_space<vmem>>) attributes {dimension_semantics = [#tpu.dimension_semantics<parallel>], iteration_bounds = array<i64: 1>, scalar_prefetch = 0 : i64, scratch_operands = 0 : i64, tpu.core_type = #tpu.core_type<tc>, window_params = [{transform_indices = @transform_0, window_bounds = array<i64: 16, 128>}, {pipeline_mode = #tpu.pipeline_mode<synchronous>, transform_indices = @transform_1, window_bounds = array<i64: 128, 256>}, {pipeline_mode = #tpu.pipeline_mode<synchronous>, transform_indices = @transform_2, window_bounds = array<i64: 1, 256>}, {pipeline_mode = #tpu.pipeline_mode<synchronous>, transform_indices = @transform_3, window_bounds = array<i64: 128, 128>}, {pipeline_mode = #tpu.pipeline_mode<synchronous>, transform_indices = @transform_4, window_bounds = array<i64: 1, 128>}, {pipeline_mode = #tpu.pipeline_mode<synchronous>, transform_indices = @transform_5, window_bounds = array<i64: 1, 128>}, {pipeline_mode = #tpu.pipeline_mode<synchronous>, transform_indices = @transform_6, window_bounds = array<i64: 1, 128>}, {transform_indices = @transform_7, window_bounds = array<i64: 16, 128>}]} {
    %c0 = arith.constant 0 : index
    %c0_0 = arith.constant 0 : index
    %0 = vector.load %arg1[%c0, %c0_0] : memref<16x128xbf16, #tpu.memory_space<vmem>>, vector<16x128xbf16>
    %c0_1 = arith.constant 0 : index
    %c0_2 = arith.constant 0 : index
    %1 = vector.load %arg2[%c0_1, %c0_2] : memref<128x256xbf16, #tpu.memory_space<vmem>>, vector<128x256xbf16>
    %cst = arith.constant dense<0.000000e+00> : vector<16x256xf32>
    %2 = tpu.matmul %0, %1, %cst {dimension_numbers = #tpu.dot_dimension_numbers<[1], [0], [0], [1], [0, 0, 1, 1], [], []>} : vector<16x128xbf16>, vector<128x256xbf16>, vector<16x256xf32> -> vector<16x256xf32>
    %c0_3 = arith.constant 0 : index
    %c0_4 = arith.constant 0 : index
    %3 = vector.load %arg3[%c0_3, %c0_4] : memref<1x256xf32, #tpu.memory_space<vmem>>, vector<1x256xf32>
    %4 = vector.broadcast %3 : vector<1x256xf32> to vector<16x256xf32>
    %5 = arith.addf %2, %4 : vector<16x256xf32>
    %6 = vector.extract_strided_slice %5 {offsets = [0, 0], sizes = [16, 128], strides = [1, 1]} : vector<16x256xf32> to vector<16x128xf32>
    %7 = vector.extract_strided_slice %5 {offsets = [0, 128], sizes = [16, 128], strides = [1, 1]} : vector<16x256xf32> to vector<16x128xf32>
    %8 = arith.negf %6 : vector<16x128xf32>
    %9 = math.exp %8 : vector<16x128xf32>
    %cst_5 = arith.constant 1.000000e+00 : f32
    %10 = vector.broadcast %cst_5 : f32 to vector<16x128xf32>
    %11 = arith.addf %10, %9 : vector<16x128xf32>
    %12 = arith.divf %10, %11 : vector<16x128xf32>
    %13 = arith.truncf %12 : vector<16x128xf32> to vector<16x128xbf16>
    %c0_6 = arith.constant 0 : index
    %c0_7 = arith.constant 0 : index
    %14 = vector.load %arg4[%c0_6, %c0_7] : memref<128x128xbf16, #tpu.memory_space<vmem>>, vector<128x128xbf16>
    %cst_8 = arith.constant dense<0.000000e+00> : vector<16x128xf32>
    %15 = tpu.matmul %13, %14, %cst_8 {dimension_numbers = #tpu.dot_dimension_numbers<[1], [0], [0], [1], [0, 0, 1, 1], [], []>} : vector<16x128xbf16>, vector<128x128xbf16>, vector<16x128xf32> -> vector<16x128xf32>
    %c0_9 = arith.constant 0 : index
    %c0_10 = arith.constant 0 : index
    %16 = vector.load %arg5[%c0_9, %c0_10] : memref<1x128xf32, #tpu.memory_space<vmem>>, vector<1x128xf32>
    %17 = vector.broadcast %16 : vector<1x128xf32> to vector<16x128xf32>
    %18 = arith.addf %15, %17 : vector<16x128xf32>
    %19 = arith.addf %7, %18 : vector<16x128xf32>
    %20 = tpu.iota {dimensions = array<i32: 1>} : vector<16x128xi32>
    %c32_i32 = arith.constant 32 : i32
    %21 = vector.broadcast %c32_i32 : i32 to vector<16x128xi32>
    %22 = arith.cmpi slt, %20, %21 : vector<16x128xi32>
    %cst_11 = arith.constant 0.000000e+00 : f32
    %23 = vector.broadcast %cst_11 : f32 to vector<16x128xf32>
    %24 = arith.select %22, %19, %23 : vector<16x128xi1>, vector<16x128xf32>
    %cst_12 = arith.constant dense<0.000000e+00> : vector<16xf32>
    %25 = vector.multi_reduction <add>, %24, %cst_12 [1] : vector<16x128xf32> to vector<16xf32>
    %26 = vector.shape_cast %25 : vector<16xf32> to vector<16x1xf32>
    %cst_13 = arith.constant 3.125000e-02 : f32
    %27 = vector.broadcast %cst_13 : f32 to vector<16x1xf32>
    %28 = arith.mulf %26, %27 : vector<16x1xf32>
    %29 = vector.broadcast %28 : vector<16x1xf32> to vector<16x128xf32>
    %30 = arith.subf %24, %29 : vector<16x128xf32>
    %cst_14 = arith.constant 0.000000e+00 : f32
    %31 = vector.broadcast %cst_14 : f32 to vector<16x128xf32>
    %32 = arith.select %22, %30, %31 : vector<16x128xi1>, vector<16x128xf32>
    %33 = arith.mulf %32, %32 : vector<16x128xf32>
    %cst_15 = arith.constant dense<0.000000e+00> : vector<16xf32>
    %34 = vector.multi_reduction <add>, %33, %cst_15 [1] : vector<16x128xf32> to vector<16xf32>
    %35 = vector.shape_cast %34 : vector<16xf32> to vector<16x1xf32>
    %cst_16 = arith.constant 3.125000e-02 : f32
    %36 = vector.broadcast %cst_16 : f32 to vector<16x1xf32>
    %37 = arith.mulf %35, %36 : vector<16x1xf32>
    %cst_17 = arith.constant 9.99999974E-6 : f32
    %38 = vector.broadcast %cst_17 : f32 to vector<16x1xf32>
    %39 = arith.addf %37, %38 : vector<16x1xf32>
    %40 = math.rsqrt %39 : vector<16x1xf32>
    %41 = vector.broadcast %40 : vector<16x1xf32> to vector<16x128xf32>
    %42 = arith.mulf %32, %41 : vector<16x128xf32>
    %c0_18 = arith.constant 0 : index
    %c0_19 = arith.constant 0 : index
    %43 = vector.load %arg6[%c0_18, %c0_19] : memref<1x128xf32, #tpu.memory_space<vmem>>, vector<1x128xf32>
    %44 = vector.broadcast %43 : vector<1x128xf32> to vector<16x128xf32>
    %45 = arith.mulf %42, %44 : vector<16x128xf32>
    %c0_20 = arith.constant 0 : index
    %c0_21 = arith.constant 0 : index
    %46 = vector.load %arg7[%c0_20, %c0_21] : memref<1x128xf32, #tpu.memory_space<vmem>>, vector<1x128xf32>
    %47 = vector.broadcast %46 : vector<1x128xf32> to vector<16x128xf32>
    %48 = arith.addf %45, %47 : vector<16x128xf32>
    %c0_22 = arith.constant 0 : index
    %c0_23 = arith.constant 0 : index
    %49 = vector.load %arg8[%c0_22, %c0_23] : memref<16x128xf32, #tpu.memory_space<vmem>>, vector<16x128xf32>
    tpu.vector_store %arg8[%c0_22, %c0_23], %48 {strides = array<i32>} : memref<16x128xf32, #tpu.memory_space<vmem>>, vector<16x128xf32>,
    return
  }
  func.func @transform_0(%arg0: i32) -> (i32, i32) {
    %c0_i32 = arith.constant 0 : i32
    %c0_i32_0 = arith.constant 0 : i32
    return %arg0, %c0_i32 : i32, i32
  }
  func.func @transform_1(%arg0: i32) -> (i32, i32) {
    %c0_i32 = arith.constant 0 : i32
    %c0_i32_0 = arith.constant 0 : i32
    %c0_i32_1 = arith.constant 0 : i32
    return %c0_i32, %c0_i32_0 : i32, i32
  }
  func.func @transform_2(%arg0: i32) -> (i32, i32) {
    %c0_i32 = arith.constant 0 : i32
    %c0_i32_0 = arith.constant 0 : i32
    %c0_i32_1 = arith.constant 0 : i32
    return %c0_i32, %c0_i32_0 : i32, i32
  }
  func.func @transform_3(%arg0: i32) -> (i32, i32) {
    %c0_i32 = arith.constant 0 : i32
    %c0_i32_0 = arith.constant 0 : i32
    %c0_i32_1 = arith.constant 0 : i32
    return %c0_i32, %c0_i32_0 : i32, i32
  }
  func.func @transform_4(%arg0: i32) -> (i32, i32) {
    %c0_i32 = arith.constant 0 : i32
    %c0_i32_0 = arith.constant 0 : i32
    %c0_i32_1 = arith.constant 0 : i32
    return %c0_i32, %c0_i32_0 : i32, i32
  }
  func.func @transform_5(%arg0: i32) -> (i32, i32) {
    %c0_i32 = arith.constant 0 : i32
    %c0_i32_0 = arith.constant 0 : i32
    %c0_i32_1 = arith.constant 0 : i32
    return %c0_i32, %c0_i32_0 : i32, i32
  }
  func.func @transform_6(%arg0: i32) -> (i32, i32) {
    %c0_i32 = arith.constant 0 : i32
    %c0_i32_0 = arith.constant 0 : i32
    %c0_i32_1 = arith.constant 0 : i32
    return %c0_i32, %c0_i32_0 : i32, i32
  }
  func.func @transform_7(%arg0: i32) -> (i32, i32) {
    %c0_i32 = arith.constant 0 : i32
    %c0_i32_0 = arith.constant 0 : i32
    return %arg0, %c0_i32 : i32, i32
  }
}

</mosaic_0001>

<bundles_post_ra>
// kernel: tpu_custom_call.1
= control target key start
LH: loop header
LB: loop body
LE: loop exit
PB: predicated region body
PF: predicated region fallthrough
CT: control target
= control target key end

     0   :  { %12 = vsyncpa [#allocation3], 0  ;;  %s708_s0 = inlined_call_operand.hbm [shape: bf16[16,128], index: 0, kind: input, shape index: {}]   ;;  %s709_s1 = inlined_call_operand.hbm [shape: bf16[128,256], index: 1, kind: input, shape index: {}]   ;;  %s710_s2 = inlined_call_operand.vmem [shape: f32[1,256], index: 2, kind: input, shape index: {}]   ;;  %s711_s3 = inlined_call_operand.hbm [shape: bf16[128,128], index: 3, kind: input, shape index: {}]   ;;  %s712_s4 = inlined_call_operand.vmem [shape: f32[1,128], index: 4, kind: input, shape index: {}]   ;;  %s713_s5 = inlined_call_operand.vmem [shape: f32[1,128], index: 5, kind: input, shape index: {}]   ;;  %s714_s6 = inlined_call_operand.vmem [shape: f32[1,128], index: 6, kind: input, shape index: {}]   ;;  %s715_s7 = inlined_call_operand.hbm [shape: f32[16,128], index: 7, kind: output, shape index: {}]  }
   0x1   :  { %13 = vsyncpa [#allocation6], 0 }
   0x2   :  { %14 = vsyncpa [#allocation4], 0  ;;  %s623_s24 = smov [#allocation5]  }
   0x3   :  { %s32_s25 = sshll.u32 %s623_s24, 4  ;;  %s33_s25 = int_to_ptr.vmem [resolvable:$true] %s32_s25 }
   0x4   :  { %s545_s26 = scalar_lea.vmem %s33_s25, 2048  ;;  %p550_p1 = scmp.lt.s32.totalorder %s33_s25, %s33_s25 }
   0x5   :  { %p546_p0 = scmp.ne.s32.totalorder %s33_s25, %s545_s26  ;;  %p551_p2 = scmp.lt.s32.totalorder %s545_s26, %s545_s26 }
   0x7   :  { %p552_p3 = por %p551_p2, %p550_p1 }
   0x9   :  { %p553_p4 = pnand %p552_p3, %p546_p0 }
   0xb   :  { %556 = shalt.err (!%p553_p4)
}
   0xc   :  { %s624_s27 = smov 128   ;;  %s625_s28 = smov 8  }
   0xd   :  { %38 = dma.hbm_to_vmem [thread:$0]  %s709_s1, 2048, %s33_s25, [#allocation6], %s624_s27, %s624_s27, %s625_s28  }
   0xe   :  { %s626_s8 = smov [#allocation2]  }
   0xf   :  { %s20_s9 = sshll.u32 %s626_s8, 4  ;;  %s21_s9 = int_to_ptr.vmem [resolvable:$true] %s20_s9 }
  0x10   :  { %s565_s10 = scalar_lea.vmem %s21_s9, 128  ;;  %p570_p6 = scmp.lt.s32.totalorder %s21_s9, %s21_s9 }
  0x11   :  { %p566_p5 = scmp.ne.s32.totalorder %s21_s9, %s565_s10  ;;  %p571_p7 = scmp.lt.s32.totalorder %s565_s10, %s565_s10 }
  0x13   :  { %p572_p8 = por %p571_p7, %p570_p6 }
  0x15   :  { %p573_p9 = pnand %p572_p8, %p566_p5 }
  0x17   :  { %576 = shalt.err (!%p573_p9)
}
  0x18   :  { %s627_s11 = smov 64   ;;  %s628_s12 = smov 4  }
  0x19   :  { %26 = dma.hbm_to_vmem [thread:$0]  %s708_s0, 128, %s21_s9, [#allocation3], %s627_s11, %s627_s11, %s628_s12  }
  0x1a   :  { %s629_s15 = smov [#allocation7]  }
  0x1b   :  { %s46_s16 = sshll.u32 %s629_s15, 4  ;;  %s47_s16 = int_to_ptr.vmem [resolvable:$true] %s46_s16 }
  0x1c   :  { %s585_s1 = scalar_lea.vmem %s47_s16, 1024  ;;  %p590_p11 = scmp.lt.s32.totalorder %s47_s16, %s47_s16 }
  0x1d   :  { %p586_p10 = scmp.ne.s32.totalorder %s47_s16, %s585_s1  ;;  %p591_p12 = scmp.lt.s32.totalorder %s585_s1, %s585_s1 }
  0x1f   :  { %p592_p13 = por %p591_p12, %p590_p11 }
  0x21   :  { %p593_p0 = pnand %p592_p13, %p586_p10 }
  0x23   :  { %596 = shalt.err (!%p593_p0)
}
  0x24   :  { %52 = dma.hbm_to_vmem [thread:$0]  %s711_s3, 1024, %s47_s16, [#allocation6], %s627_s11, %s627_s11, %s628_s12  }
  0x25   :  { %617 = dma.done.wait [#allocation3], 128  }
  0x26   :  { %618 = vsyncadd [#allocation3], 4294967168 }
  0x27   :  { %619 = dma.done.wait [#allocation6], 3072  }
  0x28   :  { %620 = vsyncadd [#allocation6], 4294964224  ;;  %v630_v0 = vmov 0   ;;  %v492_v1 = vld [vmem:[#allocation5 + $0x74] ss:$8 sps:$4 sm:$0xff]   ;;  %v631_v19 = vmov 0.0   ;;  %v89_v27 = vlaneseq }
  0x29   :  { %217 = vmatprep.mubr.bf16.mxu0 %v630_v0  ;;  %v494_v2 = vld [vmem:[#allocation5 + $0x70] ss:$8 sps:$4 sm:$0xff]   ;;  %185 = vmatprep.subr.bf16.mxu0 %v492_v1  ;;  %v495_v3 = vld [vmem:[#allocation5 + $0x64] ss:$8 sps:$4 sm:$0xff]   ;;  %v497_v4 = vld [vmem:[#allocation5 + $0x60] ss:$8 sps:$4 sm:$0xff]  }
  0x2a   :  { %186 = vmatpush1.bf16.msra.mxu0 %v494_v2  ;;  %v498_v5 = vld [vmem:[#allocation5 + $0x54] ss:$8 sps:$4 sm:$0xff]   ;;  %v500_v6 = vld [vmem:[#allocation5 + $0x50] ss:$8 sps:$4 sm:$0xff]   ;;  %v501_v7 = vld [vmem:[#allocation5 + $0x44] ss:$8 sps:$4 sm:$0xff]   ;;  %461 = vmatprep.subr.bf16.mxu1 %v631_v19 }
  0x2b   :  { %187 = vmatprep.subr.bf16.mxu0 %v495_v3  ;;  %v503_v8 = vld [vmem:[#allocation5 + $0x40] ss:$8 sps:$4 sm:$0xff]   ;;  %v504_v9 = vld [vmem:[#allocation5 + $0x34] ss:$8 sps:$4 sm:$0xff]   ;;  %v506_v10 = vld [vmem:[#allocation5 + $0x30] ss:$8 sps:$4 sm:$0xff]  }
  0x2c   :  { %v507_v11 = vld [vmem:[#allocation5 + $0x24] ss:$8 sps:$4 sm:$0xff]   ;;  %v509_v12 = vld [vmem:[#allocation5 + $0x20] ss:$8 sps:$4 sm:$0xff]   ;;  %v510_v13 = vld [vmem:[#allocation5 + $0x14] ss:$8 sps:$4 sm:$0xff]  }
  0x2d   :  { %v512_v14 = vld [vmem:[#allocation5 + $0x10] ss:$8 sps:$4 sm:$0xff]   ;;  %v513_v15 = vld [vmem:[#allocation5 + $0x4] ss:$8 sps:$4 sm:$0xff]   ;;  %v515_v16 = vld [vmem:[#allocation5] ss:$8 sps:$4 sm:$0xff]  }
  0x2e   :  { %188 = vmatpush1.bf16.msra.mxu0 %v497_v4  ;;  %v516_v17 = vld [vmem:[#allocation2] sm:$0xff]   ;;  %v518_v20 = vld [vmem:[#allocation7 + $0x30] sm:$0xff]   ;;  %v519_v21 = vld [vmem:[#allocation7 + $0x28] sm:$0xff]   ;;  %vm632_vm0 = vmmov 0   ;;  %v90_v28 = vshrl.u32 %v89_v27, 7  ;;  %v356_v49 = vand.u32 127, %v89_v27 }
  0x2f   :  { %189 = vmatprep.subr.bf16.mxu0 %v498_v5  ;;  %v517_v18 = vld [vmem:[#allocation7 + $0x38] sm:$0xff]   ;;  %v520_v22 = vld [vmem:[#allocation7 + $0x20] sm:$0xff]   ;;  %v522_v24 = vld [vmem:[#allocation7 + $0x10] sm:$0xff]   ;;  %477 = vmatprep.mubr.msk.bf16.mxu1 %vm632_vm0, %v631_v19  ;;  %s633_s23 = smov [#allocation8]  }
  0x30   :  { %462 = vmatpush3.bf16.msra.mxu1 %v517_v18  ;;  %v521_v23 = vld [vmem:[#allocation7 + $0x18] sm:$0xff]   ;;  %v523_v25 = vld [vmem:[#allocation7 + $0x8] sm:$0xff]   ;;  %v524_v26 = vld [vmem:[#allocation7] sm:$0xff]   ;;  %v91_v29 = vsub.s32 0, %v90_v28  ;;  %v95_v46 = vsub.s32 1, %v90_v28  ;;  %vm357_vm1 = vcmp.lt.s32.totalorder %v356_v49, 32 }
  0x31   :  { %463 = vmatprep.subr.bf16.mxu1 %v631_v19  ;;  %v87_v30 = vld [vmem:[%s710_s2] sm:$0x3]  ;;  %s409_s24 = sshll.u32 %s633_s23, 4  ;;  %s410_s24 = int_to_ptr.vmem [resolvable:$true] %s409_s24 }
  0x32   :  { %190 = vmatpush1.bf16.msra.mxu0 %v500_v6  ;;  %v92_v31 = vrot.slane %v87_v30, %v91_v29  ;;  %v96_v47 = vrot.slane %v87_v30, %v95_v46  ;;  %v441_v48 = vld [vmem:[%s712_s4] ss:$0 sm:$0xff]  ;;  %s597_s25 = scalar_lea.vmem %s410_s24, 256  ;;  %p602_p2 = scmp.lt.s32.totalorder %s410_s24, %s410_s24 }
  0x33   :  { %191 = vmatprep.subr.bf16.mxu0 %v501_v7  ;;  %v451_v18 = vld [vmem:[%s714_s6] ss:$0 sm:$0xff]  ;;  %p598_p1 = scmp.ne.s32.totalorder %s410_s24, %s597_s25  ;;  %p603_p3 = scmp.lt.s32.totalorder %s597_s25, %s597_s25 }
  0x34   :  { %464 = vmatpush3.bf16.msra.mxu1 %v518_v20 }
  0x35   :  { %465 = vmatprep.subr.bf16.mxu1 %v631_v19  ;;  %p604_p4 = por %p603_p3, %p602_p2 }
  0x36   :  { %192 = vmatpush1.bf16.msra.mxu0 %v503_v8 }
  0x37   :  { %193 = vmatprep.subr.bf16.mxu0 %v504_v9  ;;  %p605_p5 = pnand %p604_p4, %p598_p1 }
  0x38   :  { %466 = vmatpush3.bf16.msra.mxu1 %v519_v21 }
  0x39   :  { %467 = vmatprep.subr.bf16.mxu1 %v631_v19 }
  0x3a   :  { %194 = vmatpush1.bf16.msra.mxu0 %v506_v10 }
  0x3b   :  { %195 = vmatprep.subr.bf16.mxu0 %v507_v11 }
  0x3c   :  { %468 = vmatpush3.bf16.msra.mxu1 %v520_v22 }
  0x3d   :  { %469 = vmatprep.subr.bf16.mxu1 %v631_v19 }
  0x3e   :  { %196 = vmatpush1.bf16.msra.mxu0 %v509_v12 }
  0x3f   :  { %197 = vmatprep.subr.bf16.mxu0 %v510_v13 }
  0x40   :  { %470 = vmatpush3.bf16.msra.mxu1 %v521_v23 }
  0x41   :  { %471 = vmatprep.subr.bf16.mxu1 %v631_v19 }
  0x42   :  { %198 = vmatpush1.bf16.msra.mxu0 %v512_v14 }
  0x43   :  { %199 = vmatprep.subr.bf16.mxu0 %v513_v15 }
  0x44   :  { %472 = vmatpush3.bf16.msra.mxu1 %v522_v24 }
  0x45   :  { %473 = vmatprep.subr.bf16.mxu1 %v631_v19 }
  0x46   :  { %200 = vmatpush1.bf16.msra.mxu0 %v515_v16  ;;  %v450_v16 = vld [vmem:[%s713_s5] ss:$0 sm:$0xff] }
  0x48   :  { %474 = vmatpush3.bf16.msra.mxu1 %v523_v25 }
  0x49   :  { %218 = vmatmul.mubr.bf16.vlgmr.msra.gmra.mxu0 %v516_v17  ;;  %475 = vmatprep.subr.bf16.mxu1 %v631_v19 }
  0x4c   :  { %476 = vmatpush3.bf16.msra.mxu1 %v524_v26 }
 0x109   :  { %v219_v32 = vpop.f32.mrf.mxu0 }
 0x10a   :  { %v220_v33 = vadd.f32 %v219_v32, %v92_v31 }
 0x10b   :  { %v221_v34 = vpop.f32.mrf.mxu0 }
 0x10c   :  { %v439_v35 = vmul.f32 -1.442695, %v220_v33  ;;  %v222_v51 = vadd.f32 %v221_v34, %v96_v47 }
 0x10d   :  { %v223_v36 = vpop.f32.mrf.mxu0 }
 0x10e   :  { %525 = vpow2.f32 %v439_v35  ;;  %v224_v37 = vadd.f32 %v223_v36, %v92_v31 }
 0x10f   :  { %v225_v53 = vpop.f32.mrf.mxu0 }
 0x110   :  { %v440_v38 = vmul.f32 -1.442695, %v224_v37  ;;  %v226_v57 = vadd.f32 %v225_v53, %v96_v47 }
 0x112   :  { %527 = vpow2.f32 %v440_v38 }
 0x11b   :  { %v526_v39 = vpop.eup %525 }
 0x11c   :  { %v234_v40 = vadd.f32 1.0, %v526_v39 }
 0x11e   :  { %529 = vrcp.f32 %v234_v40 }
 0x11f   :  { %v528_v41 = vpop.eup %527 }
 0x120   :  { %v235_v42 = vadd.f32 1.0, %v528_v41 }
 0x122   :  { %531 = vrcp.f32 %v235_v42 }
 0x12b   :  { %v530_v43 = vpop.eup %529 }
 0x12f   :  { %v532_v44 = vpop.eup %531 }
 0x130   :  { %v240_v45 = vpack.c.bf16 %v532_v44, %v530_v43 }
 0x132   :  { %478 = vmatmul.mubr.bf16.vlgmr.msra.gmra.mxu1 %v240_v45 }
 0x1f2   :  { %v346_v50 = vpop.f32.mrf.mxu1 }
 0x1f3   :  { %v347_v52 = vadd.f32 %v441_v48, %v346_v50 }
 0x1f4   :  { %v479_v54 = vpop.f32.mrf.mxu1 }
 0x1f5   :  { %v353_v55 = vadd.f32 %v347_v52, %v222_v51 }
 0x1f6   :  { %v349_v56 = vpop.f32.mrf.mxu1 }
 0x1f7   :  { %v350_v58 = vadd.f32 %v441_v48, %v349_v56  ;;  %v358_v59 = vsel %vm357_vm1, %v353_v55, 0.0 }
 0x1f8   :  { %360 = vadd.xlane.f32.xlu0 %v358_v59  ;;  %v480_v60 = vpop.f32.mrf.mxu1 }
 0x1f9   :  { %v354_v61 = vadd.f32 %v350_v58, %v226_v57 }
 0x1fb   :  { %v359_v62 = vsel %vm357_vm1, %v354_v61, 0.0 }
 0x1fc   :  { %362 = vadd.xlane.f32.xlu0 %v359_v62 }
 0x281   :  { %v361_v63 = vpop.xlane.xlu0 %360 }
 0x282   :  { %v364_v0 = vmul.f32 0.03125, %v361_v63 }
 0x284   :  { %v366_v1 = vsub.f32 %v358_v59, %v364_v0 }
 0x285   :  { %v363_v2 = vpop.xlane.xlu0 %362 }
 0x286   :  { %v365_v3 = vmul.f32 0.03125, %v363_v2  ;;  %v368_v4 = vsel %vm357_vm1, %v366_v1, 0.0 }
 0x287   :  { %v370_v5 = vmul.f32 %v368_v4, %v368_v4 }
 0x288   :  { %v367_v6 = vsub.f32 %v359_v62, %v365_v3 }
 0x289   :  { %372 = vadd.xlane.f32.xlu1 %v370_v5 }
 0x28a   :  { %v369_v7 = vsel %vm357_vm1, %v367_v6, 0.0 }
 0x28b   :  { %v371_v8 = vmul.f32 %v369_v7, %v369_v7 }
 0x28d   :  { %374 = vadd.xlane.f32.xlu1 %v371_v8 }
 0x312   :  { %v373_v9 = vpop.xlane.xlu1 %372 }
 0x313   :  { %v376_v10 = vmul.f32 0.03125, %v373_v9 }
 0x315   :  { %v378_v11 = vadd.f32 1e-05, %v376_v10 }
 0x316   :  { %v375_v12 = vpop.xlane.xlu1 %374 }
 0x317   :  { %533 = vrsqrt.f32 %v378_v11  ;;  %v377_v13 = vmul.f32 0.03125, %v375_v12 }
 0x319   :  { %v379_v14 = vadd.f32 1e-05, %v377_v13 }
 0x31b   :  { %535 = vrsqrt.f32 %v379_v14 }
 0x324   :  { %v534_v15 = vpop.eup %533 }
 0x325   :  { %v382_v17 = vmul.f32 %v534_v15, %v368_v4 }
 0x327   :  { %v391_v19 = vmul.f32 %v450_v16, %v382_v17 }
 0x328   :  { %v536_v20 = vpop.eup %535 }
 0x329   :  { %v383_v21 = vmul.f32 %v536_v20, %v369_v7  ;;  %v400_v22 = vadd.f32 %v451_v18, %v391_v19 }
 0x32b   :  { %v392_v23 = vmul.f32 %v450_v16, %v383_v21  ;;  %402 = vst [vmem:[#allocation8] sm:$0xff] %v400_v22 }
 0x32d   :  { %v401_v24 = vadd.f32 %v451_v18, %v392_v23 }
 0x32f   :  { %403 = vst [vmem:[#allocation8 + $0x8] sm:$0xff] %v401_v24 }
 0x330   :  { %608 = shalt.err (!%p605_p5)
}
 0x331   :  { %415 = dma.vmem_to_hbm [thread:$0]  %s410_s24, 256, %s715_s7, [#allocation4], %s624_s27, %s624_s27, %s625_s28  }
 0x332   :  { %621 = dma.done.wait [#allocation4], 256  }
 0x333   :  { %622 = vsyncadd [#allocation4], 4294967040 }
 0x334   :  { %419 = vsyncpa [#allocation3], 1 }
 0x335   :  { %420 = vsyncpa [#allocation6], 1 }
 0x336   :  { %421 = vsyncpa [#allocation4], 1 }

</bundles_post_ra>
